<compile_context>
chip_gen: v6e
topology: v6e:2x2x1
jax: 0.10.0
libtpu: 0.0.40
codegen_flags: <defaults>
</compile_context>

<pallas_src>
import jax
import jax.numpy as jnp
from jax.experimental import pallas as pl
from jax.experimental.pallas import tpu as pltpu

EPS = 1e-6


def _gem_kernel(p_ref, x_ref, o_ref):
    # p_ref: SMEM (1,) f32  — learnable exponent p (scalar prefetch)
    # x_ref: VMEM (BLOCK_ROWS, HW) tile
    # o_ref: VMEM (BLOCK_ROWS, 1) tile
    p = p_ref[0]
    x = x_ref[...].astype(jnp.float32)
    xc = jnp.maximum(x, EPS)               # clamp(min=eps), keeps log/exp well-defined
    inv_p = 1.0 / p

    is_cube = jnp.abs(p - 3.0) < 1e-6
    is_square = jnp.abs(p - 2.0) < 1e-6
    is_other = jnp.logical_not(jnp.logical_or(is_cube, is_square))

    # Fast path p == 3 (GeM default): pure VPU multiplies, no EUP exp/log per element.
    @pl.when(is_cube)
    def _():
        xp = xc * xc * xc
        mean = jnp.mean(xp, axis=-1, keepdims=True)
        o_ref[...] = jnp.power(mean, inv_p).astype(o_ref.dtype)

    # Fast path p == 2.
    @pl.when(is_square)
    def _():
        xp = xc * xc
        mean = jnp.mean(xp, axis=-1, keepdims=True)
        o_ref[...] = jnp.power(mean, inv_p).astype(o_ref.dtype)

    # General path: x^p = exp(p * log(x)) on the EUP.
    @pl.when(is_other)
    def _():
        xp = jnp.power(xc, p)
        mean = jnp.mean(xp, axis=-1, keepdims=True)
        o_ref[...] = jnp.power(mean, inv_p).astype(o_ref.dtype)


def _choose_block_rows(rows: int, hw: int, itemsize: int) -> int:
    """Largest row tile (multiple of 8, <=2048) whose double-buffered VMEM
    footprint stays under ~16 MiB (safe on v5e/v6e/v7x scoped limits)."""
    hw_pad = ((hw + 127) // 128) * 128          # lane padding of the tile
    per_buffer_budget = 8 * 1024 * 1024         # x2 for double buffering -> 16 MiB
    br = per_buffer_budget // (hw_pad * max(itemsize, 2))
    br = max(8, min(int(br), 2048))
    br = min(br, ((rows + 7) // 8) * 8)         # never exceed (padded) row count
    return max(8, (br // 8) * 8)


def gem(x: jax.Array, p: jax.Array, eps: float = EPS) -> jax.Array:
    """GeM pooling. x: (N, C, H, W) -> (N, C, 1, 1)."""
    assert eps == EPS  # eps baked into the kernel as a compile-time constant
    N, C, H, W = x.shape
    rows, hw = N * C, H * W
    x2d = x.reshape(rows, hw)
    p_sm = p.reshape(1).astype(jnp.float32)

    block_rows = _choose_block_rows(rows, hw, jnp.dtype(x.dtype).itemsize)
    num_blocks = pl.cdiv(rows, block_rows)
    rows_padded = num_blocks * block_rows
    if rows_padded != rows:
        # Pad with 1.0 so padded rows stay finite through exp/log; discarded below.
        x2d = jnp.pad(x2d, ((0, rows_padded - rows), (0, 0)), constant_values=1.0)

    out = pl.pallas_call(
        _gem_kernel,
        out_shape=jax.ShapeDtypeStruct((rows_padded, 1), x.dtype),
        grid_spec=pltpu.PrefetchScalarGridSpec(
            num_scalar_prefetch=1,          # p lands in SMEM before the grid runs
            grid=(num_blocks,),
            in_specs=[
                pl.BlockSpec((block_rows, hw), lambda i, p_sm: (i, 0)),
            ],
            out_specs=pl.BlockSpec((block_rows, 1), lambda i, p_sm: (i, 0)),
        ),
        compiler_params=pltpu.CompilerParams(
            dimension_semantics=("parallel",),      # shard row tiles across TCs (v7x)
            vmem_limit_bytes=32 * 1024 * 1024,      # covers the double-buffered tile
        ),
    )(p_sm, x2d)

    return out[:rows].reshape(N, C, 1, 1)


def gem_reference(x, p, eps=EPS):
    # Pure-JAX reference mirroring the PyTorch forward.
    xp = jnp.power(jnp.maximum(x.astype(jnp.float32), eps), p)
    pooled = jnp.mean(xp, axis=(-2, -1), keepdims=True)
    return jnp.power(pooled, 1.0 / p).astype(x.dtype)


if __name__ == "__main__":
    key = jax.random.PRNGKey(0)
    N, C, H, W = 2, 4, 16, 16
    x = jax.random.normal(key, (N, C, H, W), dtype=jnp.float32)

    # Same init as nn.Parameter(torch.ones(1) * 3)
    p = jnp.ones((1,), dtype=jnp.float32) * 3.0

    y = gem(x, p)
    jax.block_until_ready(y)

    y_ref = gem_reference(x, p[0])
    assert y.shape == (N, C, 1, 1), y.shape
    assert jnp.allclose(y, y_ref, rtol=2e-5, atol=1e-5), (
        float(jnp.max(jnp.abs(y - y_ref)))
    )

    # Also exercise the general (non-integer p) exp/log path.
    p_gen = jnp.ones((1,), dtype=jnp.float32) * 2.7
    y2 = gem(x, p_gen)
    jax.block_until_ready(y2)
    y2_ref = gem_reference(x, p_gen[0])
    assert jnp.allclose(y2, y2_ref, rtol=2e-5, atol=1e-5), (
        float(jnp.max(jnp.abs(y2 - y2_ref)))
    )

    print("KERNEL_OK")
</pallas_src>

<mosaic_0001>
module attributes {stable_mosaic.version = 11 : i64} {
  func.func @_gem_kernel(%arg0: i32, %arg1: memref<1xf32, #tpu.memory_space<smem>>, %arg2: memref<8x256xf32, #tpu.memory_space<vmem>>, %arg3: memref<8x1xf32, #tpu.memory_space<vmem>>) attributes {dimension_semantics = [#tpu.dimension_semantics<parallel>], iteration_bounds = array<i64: 1>, scalar_prefetch = 1 : i64, scratch_operands = 0 : i64, tpu.core_type = #tpu.core_type<tc>, window_params = [{transform_indices = @transform_0, window_bounds = array<i64: 8, 256>}, {transform_indices = @transform_1, window_bounds = array<i64: 8, 1>}]} {
    %c0 = arith.constant 0 : index
    %0 = memref.load %arg1[%c0] : memref<1xf32, #tpu.memory_space<smem>>
    %c0_0 = arith.constant 0 : index
    %c0_1 = arith.constant 0 : index
    %1 = vector.load %arg2[%c0_0, %c0_1] : memref<8x256xf32, #tpu.memory_space<vmem>>, vector<8x256xf32>
    %cst = arith.constant 9.99999997E-7 : f32
    %2 = vector.broadcast %cst : f32 to vector<8x256xf32>
    %3 = arith.maximumf %1, %2 : vector<8x256xf32>
    %cst_2 = arith.constant 1.000000e+00 : f32
    %4 = arith.divf %cst_2, %0 : f32
    %cst_3 = arith.constant 3.000000e+00 : f32
    %5 = arith.subf %0, %cst_3 : f32
    %6 = math.absf %5 : f32
    %cst_4 = arith.constant 9.99999997E-7 : f32
    %7 = arith.cmpf olt, %6, %cst_4 : f32
    %cst_5 = arith.constant 2.000000e+00 : f32
    %8 = arith.subf %0, %cst_5 : f32
    %9 = math.absf %8 : f32
    %cst_6 = arith.constant 9.99999997E-7 : f32
    %10 = arith.cmpf olt, %9, %cst_6 : f32
    %11 = arith.ori %7, %10 : i1
    %true = arith.constant true
    %12 = arith.xori %11, %true : i1
    %13 = arith.extui %7 : i1 to i32
    %c0_i32 = arith.constant 0 : i32
    %14 = arith.cmpi ne, %13, %c0_i32 : i32
    scf.if %14 {
      %19 = arith.mulf %3, %3 : vector<8x256xf32>
      %20 = arith.mulf %19, %3 : vector<8x256xf32>
      %cst_9 = arith.constant dense<0.000000e+00> : vector<8xf32>
      %21 = vector.multi_reduction <add>, %20, %cst_9 [1] : vector<8x256xf32> to vector<8xf32>
      %22 = vector.shape_cast %21 : vector<8xf32> to vector<8x1xf32>
      %cst_10 = arith.constant 2.560000e+02 : f32
      %23 = vector.broadcast %cst_10 : f32 to vector<8x1xf32>
      %24 = arith.divf %22, %23 : vector<8x1xf32>
      %25 = vector.broadcast %4 : f32 to vector<8x1xf32>
      %26 = math.powf %24, %25 : vector<8x1xf32>
      %c0_11 = arith.constant 0 : index
      %c0_12 = arith.constant 0 : index
      %27 = vector.load %arg3[%c0_11, %c0_12] : memref<8x1xf32, #tpu.memory_space<vmem>>, vector<8x1xf32>
      tpu.vector_store %arg3[%c0_11, %c0_12], %26 {strides = array<i32>} : memref<8x1xf32, #tpu.memory_space<vmem>>, vector<8x1xf32>,
    } else {
    }
    %15 = arith.extui %10 : i1 to i32
    %c0_i32_7 = arith.constant 0 : i32
    %16 = arith.cmpi ne, %15, %c0_i32_7 : i32
    scf.if %16 {
      %19 = arith.mulf %3, %3 : vector<8x256xf32>
      %cst_9 = arith.constant dense<0.000000e+00> : vector<8xf32>
      %20 = vector.multi_reduction <add>, %19, %cst_9 [1] : vector<8x256xf32> to vector<8xf32>
      %21 = vector.shape_cast %20 : vector<8xf32> to vector<8x1xf32>
      %cst_10 = arith.constant 2.560000e+02 : f32
      %22 = vector.broadcast %cst_10 : f32 to vector<8x1xf32>
      %23 = arith.divf %21, %22 : vector<8x1xf32>
      %24 = vector.broadcast %4 : f32 to vector<8x1xf32>
      %25 = math.powf %23, %24 : vector<8x1xf32>
      %c0_11 = arith.constant 0 : index
      %c0_12 = arith.constant 0 : index
      %26 = vector.load %arg3[%c0_11, %c0_12] : memref<8x1xf32, #tpu.memory_space<vmem>>, vector<8x1xf32>
      tpu.vector_store %arg3[%c0_11, %c0_12], %25 {strides = array<i32>} : memref<8x1xf32, #tpu.memory_space<vmem>>, vector<8x1xf32>,
    } else {
    }
    %17 = arith.extui %12 : i1 to i32
    %c0_i32_8 = arith.constant 0 : i32
    %18 = arith.cmpi ne, %17, %c0_i32_8 : i32
    scf.if %18 {
      %19 = vector.broadcast %0 : f32 to vector<8x256xf32>
      %20 = math.powf %3, %19 : vector<8x256xf32>
      %cst_9 = arith.constant dense<0.000000e+00> : vector<8xf32>
      %21 = vector.multi_reduction <add>, %20, %cst_9 [1] : vector<8x256xf32> to vector<8xf32>
      %22 = vector.shape_cast %21 : vector<8xf32> to vector<8x1xf32>
      %cst_10 = arith.constant 2.560000e+02 : f32
      %23 = vector.broadcast %cst_10 : f32 to vector<8x1xf32>
      %24 = arith.divf %22, %23 : vector<8x1xf32>
      %25 = vector.broadcast %4 : f32 to vector<8x1xf32>
      %26 = math.powf %24, %25 : vector<8x1xf32>
      %c0_11 = arith.constant 0 : index
      %c0_12 = arith.constant 0 : index
      %27 = vector.load %arg3[%c0_11, %c0_12] : memref<8x1xf32, #tpu.memory_space<vmem>>, vector<8x1xf32>
      tpu.vector_store %arg3[%c0_11, %c0_12], %26 {strides = array<i32>} : memref<8x1xf32, #tpu.memory_space<vmem>>, vector<8x1xf32>,
    } else {
    }
    return
  }
  func.func @transform_0(%arg0: i32, %arg1: memref<1xf32, #tpu.memory_space<smem>>) -> (i32, i32) {
    %c0_i32 = arith.constant 0 : i32
    %c0_i32_0 = arith.constant 0 : i32
    return %arg0, %c0_i32 : i32, i32
  }
  func.func @transform_1(%arg0: i32, %arg1: memref<1xf32, #tpu.memory_space<smem>>) -> (i32, i32) {
    %c0_i32 = arith.constant 0 : i32
    %c0_i32_0 = arith.constant 0 : i32
    return %arg0, %c0_i32 : i32, i32
  }
}

</mosaic_0001>

<bundles_post_ra>
// kernel: tpu_custom_call.1
= control target key start
LH: loop header
LB: loop body
LE: loop exit
PB: predicated region body
PF: predicated region fallthrough
CT: control target
= control target key end

     0   :  { %8 = vsyncpa [#allocation5], 0  ;;  %s402_s9 = smov [#allocation4]   ;;  %s694_s0 = inlined_call_operand.<no memory space> [shape: f32[1], index: 0, kind: input, shape index: {}]   ;;  %s695_s1 = inlined_call_operand.hbm [shape: f32[8,256], index: 1, kind: input, shape index: {}]   ;;  %s696_s2 = inlined_call_operand.vmem [shape: f32[8,1], index: 2, kind: output, shape index: {}]  }
   0x1   :  { %s15_s10 = sshll.u32 %s402_s9, 4  ;;  %s16_s10 = int_to_ptr.vmem [resolvable:$true] %s15_s10 }
   0x2   :  { %s388_s11 = scalar_lea.vmem %s16_s10, 256  ;;  %p393_p1 = scmp.lt.s32.totalorder %s16_s10, %s16_s10 }
   0x3   :  { %p389_p0 = scmp.ne.s32.totalorder %s16_s10, %s388_s11  ;;  %p394_p2 = scmp.lt.s32.totalorder %s388_s11, %s388_s11 }
   0x5   :  { %p395_p3 = por %p394_p2, %p393_p1 }
   0x7   :  { %p396_p4 = pnand %p395_p3, %p389_p0 }
   0x9   :  { %399 = shalt.err (!%p396_p4)
}
   0xa   :  { %18 = dma.hbm_to_vmem [thread:$0]  %s695_s1, 256, %s16_s10, [#allocation5]   ;;  %v430_v0 = vstv %s694_s0 }
   0xb   :  { %400 = dma.done.wait [#allocation5], 256  }
   0xc   :  { %401 = vsyncadd [#allocation5], 4294967040  ;;  %s87_s18 = sadd.f32 -3.0, %s694_s0  ;;  %358 = vrcp.f32 %v430_v0  ;;  %v23_v1 = vld [vmem:[#allocation4] sm:$0xff]  ;;  %v24_v2 = vld [vmem:[#allocation4 + $0x8] sm:$0xff] }
   0xd   :  { %s88_s21 = sadd.f32 -2.0, %s694_s0  ;;  %v448_v3 = vmax.f32 %v23_v1, 1e-06  ;;  %v450_v4 = vmax.f32 %v24_v2, 1e-06 }
   0xe   :  { %s31_s22 = sand.u32 2147483647, %s87_s18 }
   0xf   :  { %p32_p5 = scmp.lt.f32.partialorder %s31_s22, 1e-06  ;;  %s439_s1 = sand.u32 2147483647, %s88_s21 }
  0x10   :  { %p35_p6 = scmp.lt.f32.partialorder %s439_s1, 1e-06  ;;  %v41_v6 = vmul.f32 (%p32_p5), %v448_v3, %v448_v3  ;;  %v42_v7 = vmul.f32 (%p32_p5), %v450_v4, %v450_v4  ;;  %v403_v24 = vmov (%p32_p5), 2139095040   ;;  %v404_v27 = vmov (%p32_p5), 0  }
  0x12   :  { %p444_p7 = por %p35_p6, %p32_p5  ;;  %v43_v8 = vmul.f32 (%p32_p5), %v41_v6, %v448_v3  ;;  %v44_v9 = vmul.f32 (%p32_p5), %v42_v7, %v450_v4 }
  0x14   :  { %v45_v10 = vadd.f32 (%p32_p5), %v44_v9, %v43_v8 }
  0x16   :  { %46 = vadd.xlane.f32.xlu0 (%p32_p5), %v45_v10 }
  0x19   :  { %v359_v5 = vpop.eup %358 }
  0x1a   :  { %89 = vpush %v359_v5 }
  0x47   :  { %40 = sbr.rel (!%p32_p5) target bundleno = 205 (0xcd), region = 13 }
  0x4b   :  { %s452_s0 = spop %89 }
  0x4c   :  { %v50_v14 = vstv %s452_s0 }
  0x4d   :  { %v95_v15 = vand.u32 2147483647, %v50_v14  ;;  %v100_v17 = vtrunc.f32 %v50_v14  ;;  %vm99_vm5 = vcmp.lt.f32.partialorder %v50_v14, 0 }
  0x4e   :  { %v131_v25 = vsel %vm99_vm5, 0, %v403_v24  ;;  %v119_v28 = vsel %vm99_vm5, 2139095040, %v404_v27 }
  0x4f   :  { %v104_v16 = vtrunc.f32 %v95_v15  ;;  %vm96_vm0 = vcmp.eq.f32.partialorder %v95_v15, 2139095040  ;;  %vm101_vm1 = vcmp.ne.f32.partialorder %v50_v14, %v100_v17  ;;  %vm103_vm7 = vcmp.lt.f32.partialorder %v95_v15, 1266679808 }
  0x50   :  { %vm462_vm2 = vmor %vm101_vm1, %vm96_vm0  ;;  %v132_v29 = vxor.u32 2147483648, %v131_v25 }
  0x51   :  { %v105_v18 = vcvt.f32.s32 %v104_v16  ;;  %vm108_vm4 = vmneg %vm462_vm2 }
  0x53   :  { %v106_v21 = vand.u32 1, %v105_v18 }
  0x55   :  { %vm107_vm3 = vcmp.eq.s32.totalorder %v106_v21, 1 }
  0x56   :  { %vm109_vm8 = vmand %vm107_vm3, %vm108_vm4 }
  0x57   :  { %vm472_vm11 = vmand %vm103_vm7, %vm109_vm8  ;;  %vm97_vm7 = vcmp.eq.f32.partialorder %v50_v14, 0 }
  0x58   :  { %v133_v35 = vsel %vm472_vm11, %v132_v29, %v131_v25 }
  0x9f   :  { %v47_v11 = vpop.xlane.xlu0 %46 }
  0xa0   :  { %v49_v12 = vmul.f32 0.00390625, %v47_v11 }
  0xa2   :  { %v91_v13 = vand.u32 2147483647, %v49_v12  ;;  %vm112_vm9 = vcmp.eq.f32.partialorder %v49_v12, 0  ;;  %vm111_vm12 = vcmp.lt.f32.partialorder %v49_v12, 0  ;;  %vm114_vm1 = vcmp.lt.s32.totalorder %v49_v12, 0 }
  0xa3   :  { %vm124_vm13 = vmand %vm99_vm5, %vm112_vm9  ;;  %vm128_vm4 = vcmp.eq.f32.partialorder %v49_v12, 3212836864  ;;  %vm113_vm8 = vcmp.eq.f32.partialorder %v49_v12, 1065353216  ;;  %v134_v39 = vsel %vm111_vm12, %v133_v35, %v131_v25 }
  0xa4   :  { %360 = vlog2.f32 %v91_v13  ;;  %vm115_vm6 = vcmp.gt.f32.partialorder %v91_v13, 1065353216  ;;  %vm117_vm15 = vmand %vm111_vm12, %vm462_vm2  ;;  %vm98_vm2 = vcmp.eq.f32.partialorder %v50_v14, 1065353216 }
  0xa5   :  { %vm468_vm10 = vmxor %vm99_vm5, %vm115_vm6  ;;  %vm136_vm5 = vcmp.ne.f32.partialorder %v49_v12, %v49_v12  ;;  %vm137_vm6 = vcmp.ne.f32.partialorder %v50_v14, %v50_v14 }
  0xa6   :  { %vm126_vm14 = vmor %vm124_vm13, %vm468_vm10  ;;  %vm116_vm10 = vcmp.eq.f32.partialorder %v91_v13, 2139095040 }
  0xa7   :  { %v127_v33 = vsel %vm126_vm14, 2139095040, %v404_v27  ;;  %vm121_vm3 = vmand %vm114_vm1, %vm472_vm11  ;;  %vm52_vm14 = vcmask 7168  }
  0xa8   :  { %v129_v37 = vsel %vm128_vm4, 1065353216, %v127_v33  ;;  %vm140_vm13 = vmor %vm113_vm8, %vm97_vm7 }
  0xb1   :  { %v361_v19 = vpop.eup %360 }
  0xb2   :  { %v93_v20 = vmul.f32 %v361_v19, %v50_v14 }
  0xb4   :  { %362 = vpow2.f32 %v93_v20 }
  0xc1   :  { %v363_v30 = vpop.eup %362 }
  0xc2   :  { %v118_v31 = vsel %vm117_vm15, 2143289344, %v363_v30 }
  0xc3   :  { %v120_v32 = vsel %vm112_vm9, %v119_v28, %v118_v31  ;;  %vm138_vm9 = vmor %vm136_vm5, %vm137_vm6 }
  0xc4   :  { %v122_v34 = vxor.u32 2147483648, %v120_v32 }
  0xc6   :  { %v123_v36 = vsel %vm121_vm3, %v122_v34, %v120_v32 }
  0xc7   :  { %v130_v38 = vsel %vm96_vm0, %v129_v37, %v123_v36 }
  0xc8   :  { %v135_v40 = vsel %vm116_vm10, %v134_v39, %v130_v38 }
  0xc9   :  { %v139_v41 = vsel %vm138_vm9, 2143289344, %v135_v40 }
  0xca   :  { %v141_v42 = vsel %vm140_vm13, 1065353216, %v139_v41 }
  0xcb   :  { %v142_v43 = vsel %vm98_vm2, %v49_v12, %v141_v42 }
  0xcc   :  { %53 = vst.msk [vmem:[%s696_s2] sm:$0xff] %vm52_vm14, %v142_v43 }
  0xcd PF:  { %56 = sbr.rel (!%p35_p6) target bundleno = 392 (0x188), region = 17  ;;  %v57_v44 = vmul.f32 (%p35_p6), %v448_v3, %v448_v3  ;;  %v58_v45 = vmul.f32 (%p35_p6), %v450_v4, %v450_v4  ;;  %v64_v50 = vstv (%p35_p6), %s452_s0  ;;  %v405_v60 = vmov (%p35_p6), 2139095040  }
  0xce   :  { %v147_v51 = vand.u32 (%p35_p6), 2147483647, %v64_v50  ;;  %v152_v53 = vtrunc.f32 (%p35_p6), %v64_v50  ;;  %vm151_vm3 = vcmp.lt.f32.partialorder (%p35_p6), %v64_v50, 0  ;;  %v406_v63 = vmov (%p35_p6), 0  }
  0xcf   :  { %v59_v46 = vadd.f32 (%p35_p6), %v58_v45, %v57_v44  ;;  %v183_v61 = vsel (%p35_p6), %vm151_vm3, 0, %v405_v60  ;;  %v171_v1 = vsel (%p35_p6), %vm151_vm3, 2139095040, %v406_v63 }
  0xd0   :  { %v156_v52 = vtrunc.f32 (%p35_p6), %v147_v51  ;;  %vm148_vm0 = vcmp.eq.f32.partialorder (%p35_p6), %v147_v51, 2139095040  ;;  %vm153_vm11 = vcmp.ne.f32.partialorder (%p35_p6), %v64_v50, %v152_v53  ;;  %vm155_vm5 = vcmp.lt.f32.partialorder (%p35_p6), %v147_v51, 1266679808 }
  0xd1   :  { %60 = vadd.xlane.f32.xlu0 (%p35_p6), %v59_v46  ;;  %vm498_vm12 = vmor (%p35_p6), %vm153_vm11, %vm148_vm0  ;;  %v184_v2 = vxor.u32 (%p35_p6), 2147483648, %v183_v61 }
  0xd2   :  { %v157_v54 = vcvt.f32.s32 %v156_v52  ;;  %vm160_vm1 = vmneg %vm498_vm12 }
  0xd4   :  { %v158_v57 = vand.u32 1, %v157_v54 }
  0xd6   :  { %vm159_vm15 = vcmp.eq.s32.totalorder %v158_v57, 1 }
  0xd7   :  { %vm161_vm6 = vmand %vm159_vm15, %vm160_vm1 }
  0xd8   :  { %vm508_vm10 = vmand %vm155_vm5, %vm161_vm6  ;;  %vm149_vm5 = vcmp.eq.f32.partialorder %v64_v50, 0 }
  0xd9   :  { %v185_v10 = vsel %vm508_vm10, %v184_v2, %v183_v61 }
 0x15a   :  { %v61_v47 = vpop.xlane.xlu0 %60 }
 0x15b   :  { %v63_v48 = vmul.f32 0.00390625, %v61_v47 }
 0x15d   :  { %v143_v49 = vand.u32 2147483647, %v63_v48  ;;  %vm164_vm7 = vcmp.eq.f32.partialorder %v63_v48, 0  ;;  %vm163_vm2 = vcmp.lt.f32.partialorder %v63_v48, 0  ;;  %vm166_vm11 = vcmp.lt.s32.totalorder %v63_v48, 0 }
 0x15e   :  { %vm176_vm9 = vmand %vm151_vm3, %vm164_vm7  ;;  %vm180_vm1 = vcmp.eq.f32.partialorder %v63_v48, 3212836864  ;;  %vm165_vm6 = vcmp.eq.f32.partialorder %v63_v48, 1065353216  ;;  %v186_v14 = vsel %vm163_vm2, %v185_v10, %v183_v61 }
 0x15f   :  { %364 = vlog2.f32 %v143_v49  ;;  %vm167_vm4 = vcmp.gt.f32.partialorder %v143_v49, 1065353216  ;;  %vm169_vm14 = vmand %vm163_vm2, %vm498_vm12  ;;  %vm150_vm12 = vcmp.eq.f32.partialorder %v64_v50, 1065353216 }
 0x160   :  { %vm504_vm8 = vmxor %vm151_vm3, %vm167_vm4  ;;  %vm188_vm3 = vcmp.ne.f32.partialorder %v63_v48, %v63_v48  ;;  %vm189_vm4 = vcmp.ne.f32.partialorder %v64_v50, %v64_v50 }
 0x161   :  { %vm178_vm13 = vmor %vm176_vm9, %vm504_vm8  ;;  %vm168_vm8 = vcmp.eq.f32.partialorder %v143_v49, 2139095040 }
 0x162   :  { %v179_v8 = vsel %vm178_vm13, 2139095040, %v406_v63  ;;  %vm173_vm15 = vmand %vm166_vm11, %vm508_vm10  ;;  %vm66_vm13 = vcmask 7168  }
 0x163   :  { %v181_v12 = vsel %vm180_vm1, 1065353216, %v179_v8  ;;  %vm192_vm9 = vmor %vm165_vm6, %vm149_vm5 }
 0x16c   :  { %v365_v55 = vpop.eup %364 }
 0x16d   :  { %v145_v56 = vmul.f32 %v365_v55, %v64_v50 }
 0x16f   :  { %366 = vpow2.f32 %v145_v56 }
 0x17c   :  { %v367_v5 = vpop.eup %366 }
 0x17d   :  { %v170_v6 = vsel %vm169_vm14, 2143289344, %v367_v5 }
 0x17e   :  { %v172_v7 = vsel %vm164_vm7, %v171_v1, %v170_v6  ;;  %vm190_vm7 = vmor %vm188_vm3, %vm189_vm4 }
 0x17f   :  { %v174_v9 = vxor.u32 2147483648, %v172_v7 }
 0x181   :  { %v175_v11 = vsel %vm173_vm15, %v174_v9, %v172_v7 }
 0x182   :  { %v182_v13 = vsel %vm148_vm0, %v181_v12, %v175_v11 }
 0x183   :  { %v187_v15 = vsel %vm168_vm8, %v186_v14, %v182_v13 }
 0x184   :  { %v191_v16 = vsel %vm190_vm7, 2143289344, %v187_v15 }
 0x185   :  { %v193_v17 = vsel %vm192_vm9, 1065353216, %v191_v16 }
 0x186   :  { %v194_v18 = vsel %vm150_vm12, %v63_v48, %v193_v17 }
 0x187   :  { %67 = vst.msk [vmem:[%s696_s2] sm:$0xff] %vm66_vm13, %v194_v18 }
 0x188 PF:  { %69 = sbr.rel (%p444_p7) target bundleno = 625 (0x271), region = 21 }
 0x18d   :  { %v529_v19 = vand.u32 2147483647, %v448_v3  ;;  %v533_v20 = vand.u32 2147483647, %v450_v4  ;;  %v536_v21 = vand.u32 2147483647, %v430_v0  ;;  %v204_v23 = vtrunc.f32 %v430_v0 }
 0x18e   :  { %vm203_vm14 = vcmp.lt.f32.partialorder %v430_v0, 0  ;;  %vm216_vm11 = vcmp.eq.f32.partialorder %v448_v3, 0  ;;  %vm215_vm4 = vcmp.lt.f32.partialorder %v448_v3, 0  ;;  %v407_v33 = vmov 2139095040  }
 0x18f   :  { %368 = vlog2.f32 %v529_v19  ;;  %v208_v22 = vtrunc.f32 %v536_v21  ;;  %vm200_vm0 = vcmp.eq.f32.partialorder %v536_v21, 2139095040  ;;  %vm205_vm10 = vcmp.ne.f32.partialorder %v430_v0, %v204_v23  ;;  %vm561_vm5 = vmand %vm203_vm14, %vm216_vm11 }
 0x190   :  { %370 = vlog2.f32 %v533_v20  ;;  %vm546_vm2 = vmor %vm205_vm10, %vm200_vm0  ;;  %vm219_vm15 = vcmp.gt.f32.partialorder %v529_v19, 1065353216  ;;  %v235_v34 = vsel %vm203_vm14, 0, %v407_v33  ;;  %vm207_vm8 = vcmp.lt.f32.partialorder %v536_v21, 1266679808 }
 0x191   :  { %v209_v25 = vcvt.f32.s32 %v208_v22  ;;  %vm212_vm3 = vmneg %vm546_vm2  ;;  %vm697_vm9 = vcmp.eq.f32.partialorder %v450_v4, 0  ;;  %v236_v36 = vxor.u32 2147483648, %v235_v34  ;;  %vm271_vm10 = vcmp.gt.f32.partialorder %v533_v20, 1065353216 }
 0x192   :  { %vm567_vm6 = vmxor %vm203_vm14, %vm219_vm15  ;;  %v408_v38 = vmov 0   ;;  %v78_v13 = vstv %s452_s0 }
 0x193   :  { %v210_v27 = vand.u32 1, %v209_v25  ;;  %vm579_vm7 = vmand %vm215_vm4, %vm546_vm2  ;;  %v223_v39 = vsel %vm203_vm14, 2139095040, %v408_v38  ;;  %v303_v14 = vand.u32 2147483647, %v78_v13  ;;  %v308_v16 = vtrunc.f32 %v78_v13 }
 0x194   :  { %vm230_vm13 = vmor %vm561_vm5, %vm567_vm6  ;;  %vm232_vm5 = vcmp.eq.f32.partialorder %v448_v3, 3212836864 }
 0x195   :  { %vm211_vm1 = vcmp.eq.s32.totalorder %v210_v27, 1  ;;  %v231_v42 = vsel %vm230_vm13, 2139095040, %v408_v38  ;;  %vm609_vm6 = vmxor %vm203_vm14, %vm271_vm10  ;;  %vm241_vm13 = vcmp.ne.f32.partialorder %v430_v0, %v430_v0  ;;  %vm201_vm10 = vcmp.eq.f32.partialorder %v430_v0, 0 }
 0x196   :  { %vm213_vm12 = vmand %vm211_vm1, %vm212_vm3  ;;  %vm218_vm1 = vcmp.lt.s32.totalorder %v448_v3, 0  ;;  %v233_v48 = vsel %vm232_vm5, 1065353216, %v231_v42  ;;  %v312_v15 = vtrunc.f32 %v303_v14 }
 0x197   :  { %vm589_vm15 = vmand %vm207_vm8, %vm213_vm12  ;;  %vm267_vm8 = vcmp.lt.f32.partialorder %v450_v4, 0 }
 0x198   :  { %vm601_vm3 = vmand %vm203_vm14, %vm697_vm9  ;;  %v237_v45 = vsel %vm589_vm15, %v236_v36, %v235_v34  ;;  %vm240_vm14 = vcmp.ne.f32.partialorder %v448_v3, %v448_v3  ;;  %vm220_vm9 = vcmp.eq.f32.partialorder %v529_v19, 2139095040  ;;  %v313_v17 = vcvt.f32.s32 %v312_v15 }
 0x199   :  { %vm225_vm12 = vmand %vm218_vm1, %vm589_vm15  ;;  %v238_v49 = vsel %vm215_vm4, %v237_v45, %v235_v34  ;;  %vm284_vm4 = vcmp.eq.f32.partialorder %v450_v4, 3212836864  ;;  %v290_v61 = vsel %vm267_vm8, %v237_v45, %v235_v34 }
 0x19a   :  { %vm273_vm1 = vmand %vm267_vm8, %vm546_vm2  ;;  %vm309_vm8 = vcmp.ne.f32.partialorder %v78_v13, %v308_v16 }
 0x19b   :  { %vm642_vm5 = vmor %vm240_vm14, %vm241_vm13  ;;  %vm292_vm14 = vcmp.ne.f32.partialorder %v450_v4, %v450_v4 }
 0x19c   :  { %v369_v24 = vpop.eup %368 }
 0x19d   :  { %v197_v26 = vmul.f32 %v369_v24, %v430_v0  ;;  %v371_v29 = vpop.eup %370 }
 0x19e   :  { %v249_v30 = vmul.f32 %v371_v29, %v430_v0 }
 0x19f   :  { %372 = vpow2.f32 %v197_v26 }
 0x1a0   :  { %374 = vpow2.f32 %v249_v30 }
 0x1ac   :  { %v373_v41 = vpop.eup %372 }
 0x1ad   :  { %v222_v44 = vsel %vm579_vm7, 2143289344, %v373_v41  ;;  %vm282_vm7 = vmor %vm601_vm3, %vm609_vm6  ;;  %vm270_vm3 = vcmp.lt.s32.totalorder %v450_v4, 0  ;;  %v375_v52 = vpop.eup %374  ;;  %vm727_vm6 = vcmp.eq.f32.partialorder %v450_v4, 0 }
 0x1ae   :  { %v224_v46 = vsel %vm216_vm11, %v223_v39, %v222_v44  ;;  %vm217_vm11 = vcmp.eq.f32.partialorder %v448_v3, 1065353216  ;;  %v283_v54 = vsel %vm282_vm7, 2139095040, %v408_v38  ;;  %v274_v56 = vsel %vm273_vm1, 2143289344, %v375_v52 }
 0x1af   :  { %v226_v47 = vxor.u32 2147483648, %v224_v46  ;;  %vm244_vm2 = vmor %vm217_vm11, %vm201_vm10  ;;  %v276_v58 = vsel %vm727_vm6, %v223_v39, %v274_v56  ;;  %vm269_vm7 = vcmp.eq.f32.partialorder %v450_v4, 1065353216  ;;  %v285_v60 = vsel %vm284_vm4, 1065353216, %v283_v54 }
 0x1b0   :  { %v278_v59 = vxor.u32 2147483648, %v276_v58  ;;  %vm202_vm11 = vcmp.eq.f32.partialorder %v430_v0, 1065353216  ;;  %vm296_vm1 = vmor %vm269_vm7, %vm201_vm10 }
 0x1b1   :  { %v227_v50 = vsel %vm225_vm12, %v226_v47, %v224_v46  ;;  %vm277_vm12 = vmand %vm270_vm3, %vm589_vm15  ;;  %vm307_vm3 = vcmp.lt.f32.partialorder %v78_v13, 0 }
 0x1b2   :  { %v234_v53 = vsel %vm200_vm0, %v233_v48, %v227_v50  ;;  %v279_v63 = vsel %vm277_vm12, %v278_v59, %v276_v58  ;;  %vm294_vm15 = vmor %vm292_vm14, %vm241_vm13  ;;  %v339_v19 = vsel %vm307_vm3, 0, %v407_v33 }
 0x1b3   :  { %v239_v55 = vsel %vm220_vm9, %v238_v49, %v234_v53  ;;  %vm272_vm9 = vcmp.eq.f32.partialorder %v533_v20, 2139095040  ;;  %v286_v1 = vsel %vm200_vm0, %v285_v60, %v279_v63  ;;  %vm304_vm0 = vcmp.eq.f32.partialorder %v303_v14, 2139095040 }
 0x1b4   :  { %v243_v57 = vsel %vm642_vm5, 2143289344, %v239_v55  ;;  %v291_v2 = vsel %vm272_vm9, %v290_v61, %v286_v1  ;;  %vm677_vm13 = vmor %vm309_vm8, %vm304_vm0  ;;  %v327_v20 = vsel %vm307_vm3, 2139095040, %v408_v38  ;;  %v340_v21 = vxor.u32 2147483648, %v339_v19 }
 0x1b5   :  { %v245_v62 = vsel %vm244_vm2, 1065353216, %v243_v57  ;;  %v295_v6 = vsel %vm294_vm15, 2143289344, %v291_v2  ;;  %vm316_vm5 = vmneg %vm677_vm13  ;;  %vm311_vm2 = vcmp.lt.f32.partialorder %v303_v14, 1266679808 }
 0x1b6   :  { %v246_v5 = vsel %vm202_vm11, %v448_v3, %v245_v62  ;;  %v297_v7 = vsel %vm296_vm1, 1065353216, %v295_v6  ;;  %v314_v3 = vand.u32 1, %v313_v17 }
 0x1b7   :  { %v298_v8 = vsel %vm202_vm11, %v450_v4, %v297_v7 }
 0x1b8   :  { %v73_v9 = vadd.f32 %v298_v8, %v246_v5  ;;  %vm315_vm10 = vcmp.eq.s32.totalorder %v314_v3, 1 }
 0x1b9   :  { %vm317_vm6 = vmand %vm315_vm10, %vm316_vm5 }
 0x1ba   :  { %74 = vadd.xlane.f32.xlu0 %v73_v9  ;;  %vm318_vm7 = vmand %vm311_vm2, %vm317_vm6  ;;  %vm345_vm2 = vcmp.ne.f32.partialorder %v78_v13, %v78_v13  ;;  %vm305_vm6 = vcmp.eq.f32.partialorder %v78_v13, 0 }
 0x1bb   :  { %v341_v27 = vsel %vm318_vm7, %v340_v21, %v339_v19 }
 0x243   :  { %v75_v10 = vpop.xlane.xlu0 %74 }
 0x244   :  { %v77_v11 = vmul.f32 0.00390625, %v75_v10 }
 0x246   :  { %v299_v12 = vand.u32 2147483647, %v77_v11  ;;  %vm320_vm12 = vcmp.eq.f32.partialorder %v77_v11, 0  ;;  %vm319_vm9 = vcmp.lt.f32.partialorder %v77_v11, 0  ;;  %vm322_vm8 = vcmp.lt.s32.totalorder %v77_v11, 0 }
 0x247   :  { %vm332_vm11 = vmand %vm307_vm3, %vm320_vm12  ;;  %vm336_vm5 = vcmp.eq.f32.partialorder %v77_v11, 3212836864  ;;  %v342_v31 = vsel %vm319_vm9, %v341_v27, %v339_v19 }
 0x248   :  { %376 = vlog2.f32 %v299_v12  ;;  %vm323_vm4 = vcmp.gt.f32.partialorder %v299_v12, 1065353216  ;;  %vm325_vm1 = vmand %vm319_vm9, %vm677_vm13  ;;  %vm306_vm13 = vcmp.eq.f32.partialorder %v78_v13, 1065353216 }
 0x249   :  { %vm333_vm14 = vmxor %vm307_vm3, %vm323_vm4  ;;  %vm344_vm4 = vcmp.ne.f32.partialorder %v77_v11, %v77_v11  ;;  %vm321_vm3 = vcmp.eq.f32.partialorder %v77_v11, 1065353216 }
 0x24a   :  { %vm334_vm15 = vmor %vm332_vm11, %vm333_vm14  ;;  %vm324_vm14 = vcmp.eq.f32.partialorder %v299_v12, 2139095040 }
 0x24b   :  { %v335_v25 = vsel %vm334_vm15, 2139095040, %v408_v38  ;;  %vm329_vm10 = vmand %vm322_vm8, %vm318_vm7  ;;  %vm80_vm15 = vcmask 7168  }
 0x24c   :  { %v337_v29 = vsel %vm336_vm5, 1065353216, %v335_v25  ;;  %vm348_vm11 = vmor %vm321_vm3, %vm305_vm6 }
 0x255   :  { %v377_v0 = vpop.eup %376 }
 0x256   :  { %v301_v18 = vmul.f32 %v377_v0, %v78_v13 }
 0x258   :  { %378 = vpow2.f32 %v301_v18 }
 0x265   :  { %v379_v22 = vpop.eup %378 }
 0x266   :  { %v326_v23 = vsel %vm325_vm1, 2143289344, %v379_v22 }
 0x267   :  { %v328_v24 = vsel %vm320_vm12, %v327_v20, %v326_v23  ;;  %vm346_vm12 = vmor %vm344_vm4, %vm345_vm2 }
 0x268   :  { %v330_v26 = vxor.u32 2147483648, %v328_v24 }
 0x26a   :  { %v331_v28 = vsel %vm329_vm10, %v330_v26, %v328_v24 }
 0x26b   :  { %v338_v30 = vsel %vm304_vm0, %v337_v29, %v331_v28 }
 0x26c   :  { %v343_v32 = vsel %vm324_vm14, %v342_v31, %v338_v30 }
 0x26d   :  { %v347_v33 = vsel %vm346_vm12, 2143289344, %v343_v32 }
 0x26e   :  { %v349_v34 = vsel %vm348_vm11, 1065353216, %v347_v33 }
 0x26f   :  { %v350_v35 = vsel %vm306_vm13, %v77_v11, %v349_v34 }
 0x270   :  { %81 = vst.msk [vmem:[%s696_s2] sm:$0xff] %vm80_vm15, %v350_v35 }
 0x271 PF:  { %86 = vsyncpa [#allocation5], 1 }

</bundles_post_ra>
